<compile_context>
chip_gen: v7x
topology: tpu7x:2x2x1
jax: 0.10.0
libtpu: 0.0.40
codegen_flags: <defaults>
</compile_context>

<pallas_src>
import jax
import jax.numpy as jnp
from jax import lax
from jax.experimental import pallas as pl
from jax.experimental.pallas import tpu as pltpu


def _convlstm_kernel(x_ref, patches_ref, cx_ref, wci_ref, wcf_ref, wco_ref,
                     w_ref, b_ref, hy_ref, cy_ref):
    # x_ref       : (1, 4C, HW) f32   input term (already the "input" of gates)
    # patches_ref : (1, KKC, HW) bf16 im2col of previous hidden state
    # cx_ref      : (1, C, HW)  f32   previous cell state
    # wci/wcf/wco : (1, C, HW)  f32   peephole weights
    # w_ref       : (4C, KKC)   bf16  h2h conv weight (OIHW flattened)
    # b_ref       : (4C, 1)     f32   h2h conv bias
    # hy_ref/cy_ref: (1, C, HW) outputs (lane-dense: HW = H*W lanes)
    C = cx_ref.shape[1]

    # h2h conv as one im2col MXU matmul, f32 accumulation: (4C, HW).
    conv = jnp.dot(w_ref[...], patches_ref[0],
                   preferred_element_type=jnp.float32)
    gates = x_ref[0].astype(jnp.float32) + b_ref[...] + conv     # (4C, HW) f32

    # chunk(4, channel) -> channel rows: ingate, cellgate, outgate, forgetgate
    ingate = gates[0 * C:1 * C]
    cellgate = gates[1 * C:2 * C]
    outgate = gates[2 * C:3 * C]
    forgetgate = gates[3 * C:4 * C]

    cx = cx_ref[0].astype(jnp.float32)
    cellgate = jnp.tanh(cellgate)
    ingate = jax.nn.sigmoid(ingate + cx * wci_ref[0].astype(jnp.float32))
    forgetgate = jax.nn.sigmoid(forgetgate + cx * wcf_ref[0].astype(jnp.float32))
    cy = forgetgate * cx + ingate * cellgate
    outgate = jax.nn.sigmoid(outgate + cy * wco_ref[0].astype(jnp.float32))
    hy = outgate * jnp.tanh(cy)

    hy_ref[0] = hy.astype(hy_ref.dtype)
    cy_ref[0] = cy.astype(cy_ref.dtype)


def conv_lstm_forward(x_nchw, w_oihw, bias, wci, wcf, wco,
                      hidden=None, kernel=3, drop_mask=None):
    """ConvLSTM forward. x_nchw: (B, 4C, H, W). Returns (hy, cy), each (B, C, H, W)."""
    B, C4, H, W = x_nchw.shape
    C = C4 // 4
    K = kernel
    pad = (K - 1) // 2
    HW = H * W
    KKC = K * K * C
    dtype = x_nchw.dtype

    if hidden is None:
        hx = jnp.zeros((B, C, H, W), dtype)
        cx = jnp.zeros((B, C, H, W), dtype)
    else:
        hx, cx = hidden
    if drop_mask is not None:            # training-mode recurrent dropout
        hx = hx * drop_mask

    # Channels-on-rows / spatial-on-lanes layout; NCHW flattens with no transpose.
    x_t = x_nchw.reshape(B, C4, HW)
    cx_t = cx.reshape(B, C, HW)
    wci_t = wci.reshape(B, C, HW)
    wcf_t = wcf.reshape(B, C, HW)
    wco_t = wco.reshape(B, C, HW)

    # Wrapper-side im2col of hx (glue; the matmul FLOPs are in the kernel).
    # patches[b, c*K*K + kh*K + kw, h*W + w] = hx_padded[b, c, h+kh, w+kw]
    hxp = jnp.pad(hx, ((0, 0), (0, 0), (pad, pad), (pad, pad)))
    taps = [hxp[:, :, kh:kh + H, kw:kw + W]
            for kh in range(K) for kw in range(K)]
    patches = jnp.stack(taps, axis=2).reshape(B, KKC, HW).astype(jnp.bfloat16)

    # PyTorch OIHW weight (4C, C, K, K) -> (4C, C*K*K); row order matches patches.
    w2 = w_oihw.reshape(C4, KKC).astype(jnp.bfloat16)
    b2 = bias.reshape(C4, 1).astype(jnp.float32)

    hy_t, cy_t = pl.pallas_call(
        _convlstm_kernel,
        out_shape=(jax.ShapeDtypeStruct((B, C, HW), dtype),
                   jax.ShapeDtypeStruct((B, C, HW), dtype)),
        grid=(B,),
        in_specs=[
            pl.BlockSpec((1, C4, HW), lambda b: (b, 0, 0)),    # x (input term)
            pl.BlockSpec((1, KKC, HW), lambda b: (b, 0, 0)),   # im2col(hx)
            pl.BlockSpec((1, C, HW), lambda b: (b, 0, 0)),     # cx
            pl.BlockSpec((1, C, HW), lambda b: (b, 0, 0)),     # Wci
            pl.BlockSpec((1, C, HW), lambda b: (b, 0, 0)),     # Wcf
            pl.BlockSpec((1, C, HW), lambda b: (b, 0, 0)),     # Wco
            pl.BlockSpec((C4, KKC), lambda b: (0, 0)),         # weight (resident)
            pl.BlockSpec((C4, 1), lambda b: (0, 0)),           # bias   (resident)
        ],
        out_specs=(pl.BlockSpec((1, C, HW), lambda b: (b, 0, 0)),
                   pl.BlockSpec((1, C, HW), lambda b: (b, 0, 0))),
        compiler_params=pltpu.CompilerParams(
            dimension_semantics=("parallel",)),
    )(x_t, patches, cx_t, wci_t, wcf_t, wco_t, w2, b2)

    # (B, C, HW) is already NCHW order -> plain reshape, no transpose.
    return hy_t.reshape(B, C, H, W), cy_t.reshape(B, C, H, W)


def conv_lstm_reference(x_nchw, w_oihw, bias, wci, wcf, wco,
                        hidden=None, kernel=3):
    """Pure-JAX (NCHW, f32) reference mirroring the PyTorch forward."""
    B, C4, H, W = x_nchw.shape
    C = C4 // 4
    pad = (kernel - 1) // 2
    if hidden is None:
        hx = jnp.zeros((B, C, H, W), x_nchw.dtype)
        cx = jnp.zeros((B, C, H, W), x_nchw.dtype)
    else:
        hx, cx = hidden
    conv = lax.conv_general_dilated(
        hx, w_oihw, window_strides=(1, 1),
        padding=[(pad, pad), (pad, pad)],
        dimension_numbers=("NCHW", "OIHW", "NCHW"))
    gates = x_nchw + conv + bias.reshape(1, C4, 1, 1)
    ingate, cellgate, outgate, forgetgate = jnp.split(gates, 4, axis=1)
    cellgate = jnp.tanh(cellgate)
    ingate = jax.nn.sigmoid(ingate + cx * wci)
    forgetgate = jax.nn.sigmoid(forgetgate + cx * wcf)
    cy = forgetgate * cx + ingate * cellgate
    outgate = jax.nn.sigmoid(outgate + cy * wco)
    hy = outgate * jnp.tanh(cy)
    return hy, cy


if __name__ == "__main__":
    # ConvLSTM(channel=4, kernel=3); forward input has 4*channel = 16 channels.
    B, C, H, W, K = 2, 4, 16, 16, 3
    C4 = 4 * C

    key = jax.random.PRNGKey(0)
    k_x1, k_x2, k_x3, k_w, k_b, k_ci, k_cf, k_co = jax.random.split(key, 8)

    x1 = jax.random.normal(k_x1, (B, C4, H, W), jnp.float32)
    x2 = jax.random.normal(k_x2, (B, C4, H, W), jnp.float32)
    x3 = jax.random.normal(k_x3, (B, C4, H, W), jnp.float32)

    # nn.Conv2d(channel, 4*channel, kernel) parameters (deterministic init).
    w_h2h = 0.1 * jax.random.normal(k_w, (C4, C, K, K), jnp.float32)
    b_h2h = 0.1 * jax.random.normal(k_b, (C4,), jnp.float32)

    # init_cell_weight zero-inits the peepholes ...
    wci0 = jnp.zeros((B, C, H, W), jnp.float32)
    wcf0 = jnp.zeros((B, C, H, W), jnp.float32)
    wco0 = jnp.zeros((B, C, H, W), jnp.float32)
    # ... but also test nonzero peepholes to exercise the cx*Wci / cy*Wco paths.
    wci1 = 0.1 * jax.random.normal(k_ci, (B, C, H, W), jnp.float32)
    wcf1 = 0.1 * jax.random.normal(k_cf, (B, C, H, W), jnp.float32)
    wco1 = 0.1 * jax.random.normal(k_co, (B, C, H, W), jnp.float32)

    fwd = jax.jit(conv_lstm_forward, static_argnames=("kernel",))

    # Step 1: hidden=None (zeros). Step 2: hidden fed back (h2h conv exercised).
    # Step 3: nonzero peephole weights.
    hy1, cy1 = fwd(x1, w_h2h, b_h2h, wci0, wcf0, wco0, hidden=None, kernel=K)
    hy2, cy2 = fwd(x2, w_h2h, b_h2h, wci0, wcf0, wco0, hidden=(hy1, cy1), kernel=K)
    hy3, cy3 = fwd(x3, w_h2h, b_h2h, wci1, wcf1, wco1, hidden=(hy2, cy2), kernel=K)
    jax.block_until_ready((hy3, cy3))

    # Per-call validation: the reference gets the SAME hidden state as the
    # kernel so each step checks one forward pass (bf16 MXU operands, f32
    # accumulation -> slightly relaxed tolerance).
    rhy1, rcy1 = conv_lstm_reference(x1, w_h2h, b_h2h, wci0, wcf0, wco0,
                                     hidden=None, kernel=K)
    rhy2, rcy2 = conv_lstm_reference(x2, w_h2h, b_h2h, wci0, wcf0, wco0,
                                     hidden=(hy1, cy1), kernel=K)
    rhy3, rcy3 = conv_lstm_reference(x3, w_h2h, b_h2h, wci1, wcf1, wco1,
                                     hidden=(hy2, cy2), kernel=K)

    assert hy3.shape == (B, C, H, W) and cy3.shape == (B, C, H, W)
    tol = dict(atol=3e-3, rtol=3e-3)
    assert jnp.allclose(hy1, rhy1, **tol)
    assert jnp.allclose(cy1, rcy1, **tol)
    assert jnp.allclose(hy2, rhy2, **tol)
    assert jnp.allclose(cy2, rcy2, **tol)
    assert jnp.allclose(hy3, rhy3, **tol)
    assert jnp.allclose(cy3, rcy3, **tol)

    print("KERNEL_OK")
</pallas_src>

<mosaic_0001>
module attributes {stable_mosaic.version = 11 : i64} {
  func.func @_convlstm_kernel(%arg0: i32, %arg1: memref<1x16x256xf32, #tpu.memory_space<vmem>>, %arg2: memref<1x36x256xbf16, #tpu.memory_space<vmem>>, %arg3: memref<1x4x256xf32, #tpu.memory_space<vmem>>, %arg4: memref<1x4x256xf32, #tpu.memory_space<vmem>>, %arg5: memref<1x4x256xf32, #tpu.memory_space<vmem>>, %arg6: memref<1x4x256xf32, #tpu.memory_space<vmem>>, %arg7: memref<16x36xbf16, #tpu.memory_space<vmem>>, %arg8: memref<16x1xf32, #tpu.memory_space<vmem>>, %arg9: memref<1x4x256xf32, #tpu.memory_space<vmem>>, %arg10: memref<1x4x256xf32, #tpu.memory_space<vmem>>) attributes {dimension_semantics = [#tpu.dimension_semantics<parallel>], iteration_bounds = array<i64: 2>, scalar_prefetch = 0 : i64, scratch_operands = 0 : i64, tpu.core_type = #tpu.core_type<tc>, window_params = [{transform_indices = @transform_0, window_bounds = array<i64: 1, 16, 256>}, {transform_indices = @transform_1, window_bounds = array<i64: 1, 36, 256>}, {transform_indices = @transform_2, window_bounds = array<i64: 1, 4, 256>}, {transform_indices = @transform_3, window_bounds = array<i64: 1, 4, 256>}, {transform_indices = @transform_4, window_bounds = array<i64: 1, 4, 256>}, {transform_indices = @transform_5, window_bounds = array<i64: 1, 4, 256>}, {pipeline_mode = #tpu.pipeline_mode<synchronous>, transform_indices = @transform_6, window_bounds = array<i64: 16, 36>}, {pipeline_mode = #tpu.pipeline_mode<synchronous>, transform_indices = @transform_7, window_bounds = array<i64: 16, 1>}, {transform_indices = @transform_8, window_bounds = array<i64: 1, 4, 256>}, {transform_indices = @transform_9, window_bounds = array<i64: 1, 4, 256>}]} {
    %c0 = arith.constant 0 : index
    %c0_0 = arith.constant 0 : index
    %0 = vector.load %arg7[%c0, %c0_0] : memref<16x36xbf16, #tpu.memory_space<vmem>>, vector<16x36xbf16>
    %c0_1 = arith.constant 0 : index
    %c0_2 = arith.constant 0 : index
    %c0_3 = arith.constant 0 : index
    %1 = vector.load %arg2[%c0_1, %c0_2, %c0_3] : memref<1x36x256xbf16, #tpu.memory_space<vmem>>, vector<1x36x256xbf16>
    %2 = vector.shape_cast %1 : vector<1x36x256xbf16> to vector<36x256xbf16>
    %cst = arith.constant dense<0.000000e+00> : vector<16x256xf32>
    %3 = tpu.matmul %0, %2, %cst {dimension_numbers = #tpu.dot_dimension_numbers<[1], [0], [0], [1], [0, 0, 1, 1], [], []>} : vector<16x36xbf16>, vector<36x256xbf16>, vector<16x256xf32> -> vector<16x256xf32>
    %c0_4 = arith.constant 0 : index
    %c0_5 = arith.constant 0 : index
    %c0_6 = arith.constant 0 : index
    %4 = vector.load %arg1[%c0_4, %c0_5, %c0_6] : memref<1x16x256xf32, #tpu.memory_space<vmem>>, vector<1x16x256xf32>
    %5 = vector.shape_cast %4 : vector<1x16x256xf32> to vector<16x256xf32>
    %c0_7 = arith.constant 0 : index
    %c0_8 = arith.constant 0 : index
    %6 = vector.load %arg8[%c0_7, %c0_8] : memref<16x1xf32, #tpu.memory_space<vmem>>, vector<16x1xf32>
    %7 = vector.broadcast %6 : vector<16x1xf32> to vector<16x256xf32>
    %8 = arith.addf %5, %7 : vector<16x256xf32>
    %9 = arith.addf %8, %3 : vector<16x256xf32>
    %10 = vector.extract_strided_slice %9 {offsets = [0, 0], sizes = [4, 256], strides = [1, 1]} : vector<16x256xf32> to vector<4x256xf32>
    %11 = vector.extract_strided_slice %9 {offsets = [4, 0], sizes = [4, 256], strides = [1, 1]} : vector<16x256xf32> to vector<4x256xf32>
    %12 = vector.extract_strided_slice %9 {offsets = [8, 0], sizes = [4, 256], strides = [1, 1]} : vector<16x256xf32> to vector<4x256xf32>
    %13 = vector.extract_strided_slice %9 {offsets = [12, 0], sizes = [4, 256], strides = [1, 1]} : vector<16x256xf32> to vector<4x256xf32>
    %c0_9 = arith.constant 0 : index
    %c0_10 = arith.constant 0 : index
    %c0_11 = arith.constant 0 : index
    %14 = vector.load %arg3[%c0_9, %c0_10, %c0_11] : memref<1x4x256xf32, #tpu.memory_space<vmem>>, vector<1x4x256xf32>
    %15 = vector.shape_cast %14 : vector<1x4x256xf32> to vector<4x256xf32>
    %16 = math.tanh %11 : vector<4x256xf32>
    %c0_12 = arith.constant 0 : index
    %c0_13 = arith.constant 0 : index
    %c0_14 = arith.constant 0 : index
    %17 = vector.load %arg4[%c0_12, %c0_13, %c0_14] : memref<1x4x256xf32, #tpu.memory_space<vmem>>, vector<1x4x256xf32>
    %18 = vector.shape_cast %17 : vector<1x4x256xf32> to vector<4x256xf32>
    %19 = arith.mulf %15, %18 : vector<4x256xf32>
    %20 = arith.addf %10, %19 : vector<4x256xf32>
    %21 = arith.negf %20 : vector<4x256xf32>
    %22 = math.exp %21 : vector<4x256xf32>
    %cst_15 = arith.constant 1.000000e+00 : f32
    %23 = vector.broadcast %cst_15 : f32 to vector<4x256xf32>
    %24 = arith.addf %23, %22 : vector<4x256xf32>
    %25 = arith.divf %23, %24 : vector<4x256xf32>
    %c0_16 = arith.constant 0 : index
    %c0_17 = arith.constant 0 : index
    %c0_18 = arith.constant 0 : index
    %26 = vector.load %arg5[%c0_16, %c0_17, %c0_18] : memref<1x4x256xf32, #tpu.memory_space<vmem>>, vector<1x4x256xf32>
    %27 = vector.shape_cast %26 : vector<1x4x256xf32> to vector<4x256xf32>
    %28 = arith.mulf %15, %27 : vector<4x256xf32>
    %29 = arith.addf %13, %28 : vector<4x256xf32>
    %30 = arith.negf %29 : vector<4x256xf32>
    %31 = math.exp %30 : vector<4x256xf32>
    %cst_19 = arith.constant 1.000000e+00 : f32
    %32 = vector.broadcast %cst_19 : f32 to vector<4x256xf32>
    %33 = arith.addf %32, %31 : vector<4x256xf32>
    %34 = arith.divf %32, %33 : vector<4x256xf32>
    %35 = arith.mulf %34, %15 : vector<4x256xf32>
    %36 = arith.mulf %25, %16 : vector<4x256xf32>
    %37 = arith.addf %35, %36 : vector<4x256xf32>
    %c0_20 = arith.constant 0 : index
    %c0_21 = arith.constant 0 : index
    %c0_22 = arith.constant 0 : index
    %38 = vector.load %arg6[%c0_20, %c0_21, %c0_22] : memref<1x4x256xf32, #tpu.memory_space<vmem>>, vector<1x4x256xf32>
    %39 = vector.shape_cast %38 : vector<1x4x256xf32> to vector<4x256xf32>
    %40 = arith.mulf %37, %39 : vector<4x256xf32>
    %41 = arith.addf %12, %40 : vector<4x256xf32>
    %42 = arith.negf %41 : vector<4x256xf32>
    %43 = math.exp %42 : vector<4x256xf32>
    %cst_23 = arith.constant 1.000000e+00 : f32
    %44 = vector.broadcast %cst_23 : f32 to vector<4x256xf32>
    %45 = arith.addf %44, %43 : vector<4x256xf32>
    %46 = arith.divf %44, %45 : vector<4x256xf32>
    %47 = math.tanh %37 : vector<4x256xf32>
    %48 = arith.mulf %46, %47 : vector<4x256xf32>
    %c0_24 = arith.constant 0 : index
    %c0_25 = arith.constant 0 : index
    %c0_26 = arith.constant 0 : index
    %49 = vector.load %arg9[%c0_24, %c0_25, %c0_26] : memref<1x4x256xf32, #tpu.memory_space<vmem>>, vector<1x4x256xf32>
    %50 = vector.shape_cast %49 : vector<1x4x256xf32> to vector<4x256xf32>
    %51 = vector.shape_cast %48 : vector<4x256xf32> to vector<1x4x256xf32>
    tpu.vector_store %arg9[%c0_24, %c0_25, %c0_26], %51 {strides = array<i32>} : memref<1x4x256xf32, #tpu.memory_space<vmem>>, vector<1x4x256xf32>,
    %c0_27 = arith.constant 0 : index
    %c0_28 = arith.constant 0 : index
    %c0_29 = arith.constant 0 : index
    %52 = vector.load %arg10[%c0_27, %c0_28, %c0_29] : memref<1x4x256xf32, #tpu.memory_space<vmem>>, vector<1x4x256xf32>
    %53 = vector.shape_cast %52 : vector<1x4x256xf32> to vector<4x256xf32>
    %54 = vector.shape_cast %37 : vector<4x256xf32> to vector<1x4x256xf32>
    tpu.vector_store %arg10[%c0_27, %c0_28, %c0_29], %54 {strides = array<i32>} : memref<1x4x256xf32, #tpu.memory_space<vmem>>, vector<1x4x256xf32>,
    return
  }
  func.func @transform_0(%arg0: i32) -> (i32, i32, i32) {
    %c0_i32 = arith.constant 0 : i32
    %c0_i32_0 = arith.constant 0 : i32
    %c0_i32_1 = arith.constant 0 : i32
    return %arg0, %c0_i32, %c0_i32_0 : i32, i32, i32
  }
  func.func @transform_1(%arg0: i32) -> (i32, i32, i32) {
    %c0_i32 = arith.constant 0 : i32
    %c0_i32_0 = arith.constant 0 : i32
    %c0_i32_1 = arith.constant 0 : i32
    return %arg0, %c0_i32, %c0_i32_0 : i32, i32, i32
  }
  func.func @transform_2(%arg0: i32) -> (i32, i32, i32) {
    %c0_i32 = arith.constant 0 : i32
    %c0_i32_0 = arith.constant 0 : i32
    %c0_i32_1 = arith.constant 0 : i32
    return %arg0, %c0_i32, %c0_i32_0 : i32, i32, i32
  }
  func.func @transform_3(%arg0: i32) -> (i32, i32, i32) {
    %c0_i32 = arith.constant 0 : i32
    %c0_i32_0 = arith.constant 0 : i32
    %c0_i32_1 = arith.constant 0 : i32
    return %arg0, %c0_i32, %c0_i32_0 : i32, i32, i32
  }
  func.func @transform_4(%arg0: i32) -> (i32, i32, i32) {
    %c0_i32 = arith.constant 0 : i32
    %c0_i32_0 = arith.constant 0 : i32
    %c0_i32_1 = arith.constant 0 : i32
    return %arg0, %c0_i32, %c0_i32_0 : i32, i32, i32
  }
  func.func @transform_5(%arg0: i32) -> (i32, i32, i32) {
    %c0_i32 = arith.constant 0 : i32
    %c0_i32_0 = arith.constant 0 : i32
    %c0_i32_1 = arith.constant 0 : i32
    return %arg0, %c0_i32, %c0_i32_0 : i32, i32, i32
  }
  func.func @transform_6(%arg0: i32) -> (i32, i32) {
    %c0_i32 = arith.constant 0 : i32
    %c0_i32_0 = arith.constant 0 : i32
    %c0_i32_1 = arith.constant 0 : i32
    return %c0_i32, %c0_i32_0 : i32, i32
  }
  func.func @transform_7(%arg0: i32) -> (i32, i32) {
    %c0_i32 = arith.constant 0 : i32
    %c0_i32_0 = arith.constant 0 : i32
    %c0_i32_1 = arith.constant 0 : i32
    return %c0_i32, %c0_i32_0 : i32, i32
  }
  func.func @transform_8(%arg0: i32) -> (i32, i32, i32) {
    %c0_i32 = arith.constant 0 : i32
    %c0_i32_0 = arith.constant 0 : i32
    %c0_i32_1 = arith.constant 0 : i32
    return %arg0, %c0_i32, %c0_i32_0 : i32, i32, i32
  }
  func.func @transform_9(%arg0: i32) -> (i32, i32, i32) {
    %c0_i32 = arith.constant 0 : i32
    %c0_i32_0 = arith.constant 0 : i32
    %c0_i32_1 = arith.constant 0 : i32
    return %arg0, %c0_i32, %c0_i32_0 : i32, i32, i32
  }
}

</mosaic_0001>

<bundles_post_ra>
// kernel: conv_lstm_forward.1
= control target key start
LH: loop header
LB: loop body
LE: loop exit
PB: predicated region body
PF: predicated region fallthrough
CT: control target
= control target key end

     0   :  { %s975_s30 = smov 0   ;;  %s1039_s0 = inlined_call_operand.vmem [shape: f32[2,16,256], index: 0, kind: input, shape index: {}]   ;;  %s1040_s1 = inlined_call_operand.vmem [shape: bf16[2,36,256], index: 1, kind: input, shape index: {}]   ;;  %s1041_s2 = inlined_call_operand.vmem [shape: f32[2,4,256], index: 2, kind: input, shape index: {}]   ;;  %s1042_s3 = inlined_call_operand.vmem [shape: f32[2,4,256], index: 3, kind: input, shape index: {}]   ;;  %s1043_s4 = inlined_call_operand.vmem [shape: f32[2,4,256], index: 4, kind: input, shape index: {}]   ;;  %s1044_s5 = inlined_call_operand.vmem [shape: f32[2,4,256], index: 5, kind: input, shape index: {}]   ;;  %s1045_s6 = inlined_call_operand.vmem [shape: bf16[16,36], index: 6, kind: input, shape index: {}]   ;;  %s1046_s7 = inlined_call_operand.vmem [shape: f32[16,1], index: 7, kind: input, shape index: {}]   ;;  %s1047_s8 = inlined_call_operand.vmem [shape: f32[2,4,256], index: 8, kind: output, shape index: {0}]   ;;  %s1048_s9 = inlined_call_operand.vmem [shape: f32[2,4,256], index: 9, kind: output, shape index: {1}]  }
   0x1 LB: > { %s818_s10 = sadd.s32 4294967295, %s922_s30   ;;  %p822_p0 = scmp.ge.s32.totalorder %s922_s30, 1  ;;  %s922_s30 = sphi %s975_s30, %s20_s30  }
   0x2   : > { %p340_p1 = scmp.lt.s32.totalorder %s922_s30, 3 }
   0x4   : > { %p341_p2 = pnand %p822_p0, %p340_p1 }
   0x5   : > { %p406_p3 = scmp.lt.s32.totalorder (!%p341_p2), %s818_s10, 1  ;;  %v924_v0 = vmov (!%p341_p2), 0   ;;  %v542_v1 = vld [vmem:[%s1046_s7] sm:$0xff] (!%p341_p2)  ;;  %v543_v2 = vld [vmem:[%s1046_s7 + $0x8] sm:$0xff] (!%p341_p2)  ;;  %vm488_vm0 = vcmask (!%p341_p2), 1041408   ;;  %vm484_vm1 = vcmask (!%p341_p2), 293888  }
   0x6   : > { %344 = sbr.rel (%p341_p2) target bundleno = 316 (0x13c), region = 52  ;;  %527 = vmatprep.mubr.bf16.mxu0 (!%p341_p2), %v924_v0  ;;  %872 = vset.pattern.permute.xlu0 (!%p341_p2), %v924_v0  ;;  %v881_v11 = vld [vmem:[%s1045_s6] sm:$0xff] (!%p341_p2)  }
   0x7   : > { %546 = vperm.xlu0 (!%p341_p2), %872, %v542_v1  }
   0xb   : > { %551 = vperm.xlu0 (!%p341_p2), %872, %v543_v2  }
   0xd   : > { %s1050_s10 = smov (!%p406_p3, %s818_s10), 1 }
   0xe   : > { %s862_s15 = smul.u32 40, %s1050_s10  ;;  %s999_s21 = sshll.u32 %s1050_s10, 3 }
   0xf   : > { %s855_s22 = sshll.u32 %s1050_s10, 5  ;;  %s420_s25 = scalar_lea.vmem %s1041_s2, %s999_s21 }
  0x10   : > { %s415_s18 = scalar_lea.vmem %s1040_s1, %s862_s15  ;;  %s425_s28 = scalar_lea.vmem %s1042_s3, %s999_s21  ;;  %v1017_v13 = vld [vmem:[%s420_s25] sm:$0xff] }
  0x11   : > { %v873_v3 = vld [vmem:[%s415_s18 + $0x4] ss:$8 sps:$4 sm:$0xff]   ;;  %v875_v4 = vld [vmem:[%s415_s18] ss:$8 sps:$4 sm:$0xff]   ;;  %v876_v5 = vld [vmem:[%s415_s18 + $0x14] ss:$8 sps:$4 sm:$0xff]   ;;  %s410_s12 = scalar_lea.vmem %s1039_s0, %s855_s22  ;;  %s430_s15 = scalar_lea.vmem %s1043_s4, %s999_s21  ;;  %v604_v55 = vcombine.low %v1017_v13, %v1017_v13 }
  0x12   : > { %495 = vmatprep.subr.bf16.mxu0 %v873_v3  ;;  %v453_v6 = vld [vmem:[%s415_s18 + $0x20] sm:$0x33]  ;;  %v878_v7 = vld [vmem:[%s415_s18 + $0x10] ss:$8 sps:$4 sm:$0xff]   ;;  %v539_v18 = vld [vmem:[%s410_s12 + $0x8] sm:$0xff]  ;;  %s435_s17 = scalar_lea.vmem %s1044_s5, %s999_s21  ;;  %s445_s20 = scalar_lea.vmem %s1048_s9, %s999_s21 }
  0x13   : > { %496 = vmatpush1.bf16.msra.mxu0 %v875_v4  ;;  %v844_v8 = vcombine.high %v453_v6, %v453_v6  ;;  %v843_v9 = vcombine.low %v453_v6, %v453_v6  ;;  %v565_v14 = vld [vmem:[%s425_s28] sm:$0xff]  ;;  %v540_v22 = vld [vmem:[%s410_s12 + $0x10] sm:$0xff]  ;;  %v541_v23 = vld [vmem:[%s410_s12 + $0x18] sm:$0xff]  ;;  %s440_s24 = scalar_lea.vmem %s1047_s8, %s999_s21 }
  0x14   : > { %497 = vmatprep.subr.bf16.mxu0 %v876_v5  ;;  %v538_v15 = vld [vmem:[%s410_s12] sm:$0xff]  ;;  %v566_v17 = vmul.f32 %v565_v14, %v1017_v13 }
  0x15   : > { %v490_v10 = vsel %vm488_vm0, %v843_v9, 0  ;;  %v584_v16 = vld [vmem:[%s430_s15] sm:$0xff] }
  0x16   : > { %v585_v20 = vmul.f32 %v584_v16, %v1017_v13  ;;  %v568_v26 = vcombine.high %v566_v17, %v566_v17  ;;  %v624_v59 = vld [vmem:[%s435_s17] sm:$0xff] }
  0x17   : > { %498 = vmatpush1.bf16.msra.mxu0 %v878_v7  ;;  %v626_v3 = vcombine.low %v624_v59, %v624_v59 }
  0x18   : > { %845 = vmatprep.subr.msk.bf16.mxu0 %vm488_vm0, %v844_v8  ;;  %v587_v30 = vcombine.low %v585_v20, %v585_v20 }
  0x1b   : > { %500 = vmatpush1.bf16.msra.mxu0 %v490_v10 }
  0x1e   : > { %846 = vmatmul.mubr.msk.bf16.vlgmr.msra.gmra.mrb[0].mxu0 %vm484_vm1, %v881_v11 }
  0x86   : > { %v547_v12 = vpop.permute.xlu0 %546 }
  0x87   : > { %v554_v19 = vadd.f32 %v547_v12, %v538_v15  ;;  %v555_v24 = vadd.f32 %v547_v12, %v539_v18 }
  0x8a   : > { %v552_v21 = vpop.permute.xlu0 %551 }
  0x8b   : > { %v556_v27 = vadd.f32 %v552_v21, %v540_v22  ;;  %v557_v31 = vadd.f32 %v552_v21, %v541_v23 }
  0xf1   : > { %v529_v25 = vpop.f32.mrb[0].mxu0 }
  0xf2   : > { %v558_v28 = vadd.f32 %v554_v19, %v529_v25  ;;  %v531_v29 = vpop.f32.mrb[1].mxu0 }
  0xf3   : > { %v559_v32 = vadd.f32 %v555_v24, %v531_v29  ;;  %v533_v33 = vpop.f32.mrb[2].mxu0 }
  0xf4   : > { %v570_v34 = vadd.f32 %v566_v17, %v558_v28  ;;  %v560_v35 = vadd.f32 %v556_v27, %v533_v33  ;;  %v535_v36 = vpop.f32.mrb[3].mxu0 }
  0xf5   : > { %v571_v37 = vadd.f32 %v568_v26, %v559_v32  ;;  %v561_v38 = vadd.f32 %v557_v31, %v535_v36 }
  0xf6   : > { %v847_v39 = vmul.f32 -1.442695, %v570_v34  ;;  %v589_v40 = vadd.f32 %v587_v30, %v560_v35 }
  0xf7   : > { %v848_v41 = vmul.f32 -1.442695, %v571_v37  ;;  %v590_v42 = vadd.f32 %v585_v20, %v561_v38 }
  0xf8   : > { %884 = vpow2.f32 %v847_v39  ;;  %v849_v43 = vmul.f32 -1.442695, %v589_v40 }
  0xf9   : > { %886 = vpow2.f32 %v848_v41  ;;  %v850_v44 = vmul.f32 -1.442695, %v590_v42 }
  0xfa   : > { %888 = vpow2.f32 %v849_v43 }
  0xfb   : > { %890 = vpow2.f32 %v850_v44 }
  0xfc   : > { %892 = vtanh.f32 %v558_v28 }
  0xfd   : > { %894 = vtanh.f32 %v559_v32 }
 0x102   : > { %v885_v45 = vpop.eup %884 }
 0x103   : > { %v887_v46 = vpop.eup %886  ;;  %v578_v47 = vadd.f32 1.0, %v885_v45 }
 0x104   : > { %v889_v48 = vpop.eup %888  ;;  %v579_v49 = vadd.f32 1.0, %v887_v46 }
 0x105   : > { %v891_v50 = vpop.eup %890  ;;  %896 = vrcp.f32 %v578_v47  ;;  %v597_v51 = vadd.f32 1.0, %v889_v48 }
 0x106   : > { %898 = vrcp.f32 %v579_v49  ;;  %v598_v52 = vadd.f32 1.0, %v891_v50  ;;  %v893_v53 = vpop.eup %892 }
 0x107   : > { %900 = vrcp.f32 %v597_v51  ;;  %v895_v54 = vpop.eup %894  ;;  %v610_v56 = vrot.slane %v893_v53, 4 }
 0x108   : > { %902 = vrcp.f32 %v598_v52  ;;  %v611_v58 = vrot.slane %v895_v54, 4 }
 0x10f   : > { %v897_v57 = vpop.eup %896 }
 0x110   : > { %v899_v60 = vpop.eup %898  ;;  %v614_v61 = vmul.f32 %v897_v57, %v610_v56 }
 0x111   : > { %v901_v62 = vpop.eup %900  ;;  %v615_v63 = vmul.f32 %v899_v60, %v611_v58 }
 0x112   : > { %v903_v0 = vpop.eup %902  ;;  %v618_v1 = vrot.slane %v614_v61, 4  ;;  %v606_v2 = vmul.f32 %v901_v62, %v604_v55 }
 0x113   : > { %v619_v4 = vrot.slane %v615_v63, 4  ;;  %v607_v5 = vmul.f32 %v903_v0, %v1017_v13 }
 0x114   : > { %v622_v6 = vadd.f32 %v618_v1, %v606_v2 }
 0x115   : > { %v623_v7 = vadd.f32 %v619_v4, %v607_v5 }
 0x116   : > { %v628_v8 = vmul.f32 %v626_v3, %v622_v6 }
 0x117   : > { %v629_v9 = vmul.f32 %v624_v59, %v623_v7  ;;  %v667_v10 = vcombine.high %v622_v6, %v623_v7 }
 0x118   : > { %v632_v11 = vrot.slane %v628_v8, 4 }
 0x119   : > { %v633_v12 = vrot.slane %v629_v9, 4  ;;  %669 = vst [vmem:[%s445_s20] sm:$0xff] %v667_v10 }
 0x11a   : > { %v636_v14 = vadd.f32 %v632_v11, %v560_v35 }
 0x11b   : > { %v637_v15 = vadd.f32 %v633_v12, %v561_v38 }
 0x11c   : > { %v851_v16 = vmul.f32 -1.442695, %v636_v14 }
 0x11d   : > { %v852_v17 = vmul.f32 -1.442695, %v637_v15 }
 0x11e   : > { %904 = vpow2.f32 %v851_v16 }
 0x11f   : > { %906 = vpow2.f32 %v852_v17 }
 0x120   : > { %908 = vtanh.f32 %v622_v6 }
 0x121   : > { %910 = vtanh.f32 %v623_v7 }
 0x128   : > { %v905_v13 = vpop.eup %904 }
 0x129   : > { %v907_v18 = vpop.eup %906  ;;  %v644_v19 = vadd.f32 1.0, %v905_v13 }
 0x12a   : > { %v645_v20 = vadd.f32 1.0, %v907_v18  ;;  %v909_v21 = vpop.eup %908 }
 0x12b   : > { %912 = vrcp.f32 %v644_v19  ;;  %v911_v22 = vpop.eup %910  ;;  %v654_v23 = vrot.slane %v909_v21, 4 }
 0x12c   : > { %914 = vrcp.f32 %v645_v20  ;;  %v655_v25 = vrot.slane %v911_v22, 4 }
 0x135   : > { %v913_v24 = vpop.eup %912 }
 0x136   : > { %v915_v26 = vpop.eup %914  ;;  %v658_v27 = vmul.f32 %v913_v24, %v654_v23 }
 0x137   : > { %v659_v28 = vmul.f32 %v915_v26, %v655_v25 }
 0x139   : > { %v662_v29 = vcombine.low %v658_v27, %v659_v28 }
 0x13b   : > { %664 = vst [vmem:[%s440_s24] sm:$0xff] %v662_v29 }
 0x13c PF: > { %s20_s30 = sadd.s32 1, %s922_s30  }
 0x13d   : > { %p17_p4 = scmp.ge.s32.totalorder %s20_s30, 4  }
 0x13f   :  { %19 = sbr.rel (!%p17_p4) target bundleno = 1 (0x1), region = 109 }

</bundles_post_ra>
